<compile_context>
chip_gen: v7x
topology: tpu7x:2x2x1
jax: 0.10.0
libtpu: 0.0.40
codegen_flags: <defaults>
</compile_context>

<pallas_src>
import functools
import math

import jax
import jax.numpy as jnp
import numpy as np
from jax.experimental import pallas as pl
from jax.experimental.pallas import tpu as pltpu


def _round_up(x, m):
    return ((x + m - 1) // m) * m


# ----------------------------- Pallas kernel ---------------------------------
def _patch_embed_kernel(x_ref, w_ref, b_ref, o_ref, *, ph, compute_dtype):
    # x_ref: (1, C, RH*pH, Wp, pW)  tile holding RH rows of patches (input dtype)
    # w_ref: (K, E_pad)             conv weight flattened in (c, ph, pw) order
    # b_ref: (1, E_pad)             conv bias (fp32, zero-padded)
    # o_ref: (1, RH, Wp, E_pad)     lane-dense output tile
    _, c, rhph, wp, pw = x_ref.shape
    kdim, e_pad = w_ref.shape
    rh_per_tile = rhph // ph

    w = w_ref[...]                                           # resident (K, E_pad)
    bias = jnp.broadcast_to(b_ref[...], (wp, e_pad))          # hoisted out of loop

    for r in range(rh_per_tile):                              # short static loop
        # (C, pH, Wp, pW) window for one row of patches.
        xt = x_ref[0, :, pl.ds(r * ph, ph), :, :]
        # Build the patch matrix entirely in VMEM (no extra HBM pass):
        xs = jnp.swapaxes(xt, 2, 3)                           # (C, pH, pW, Wp)
        pt = xs.reshape(kdim, wp)                             # (K, Wp) = patches^T
        p = pt.T.astype(compute_dtype)                        # (Wp, K) bf16 for MXU
        acc = jnp.dot(p, w, preferred_element_type=jnp.float32)   # (Wp, E_pad) f32
        o_ref[0, r, :, :] = (acc + bias).astype(o_ref.dtype)


# ----------------------------- pallas_call wrapper ----------------------------
def patch_proj_pallas(x, w_kE, bias_row, patch_size, *, compute_dtype=jnp.bfloat16,
                      target_patches_per_step=256):
    """Fused patch extraction + projection.

    x:        (B, C, H, W)  NCHW activations (any float dtype)
    w_kE:     (K, E_pad)    flattened conv weight, E padded to a multiple of 128
    bias_row: (1, E_pad)    fp32 bias (zero-padded)
    returns   (B, Hp, Wp, E_pad) in x.dtype (lane-dense embedding axis).
    """
    B, C, H, W = x.shape
    pH, pW = patch_size
    assert H % pH == 0 and W % pW == 0, "image size must be divisible by patch size"
    Hp, Wp = H // pH, W // pW
    K, E_pad = w_kE.shape
    assert K == C * pH * pW

    # Rows of patches per grid step: amortises per-step overhead while keeping
    # the double-buffered tiles comfortably inside VMEM on v5e/v6e/v7x.
    rh = 1
    for d in range(1, Hp + 1):
        if Hp % d == 0 and d * Wp <= target_patches_per_step:
            rh = d

    # Free reshape (row-major split of W only): (B, C, H, W) -> (B, C, H, Wp, pW).
    x5 = x.reshape(B, C, H, Wp, pW)

    grid = (B, Hp // rh)
    kernel = functools.partial(_patch_embed_kernel, ph=pH, compute_dtype=compute_dtype)

    out_bytes = B * Hp * Wp * E_pad * x.dtype.itemsize
    cost = pl.CostEstimate(
        flops=2 * B * Hp * Wp * K * E_pad,
        transcendentals=0,
        bytes_accessed=(x.size * x.dtype.itemsize
                        + w_kE.size * w_kE.dtype.itemsize
                        + bias_row.size * bias_row.dtype.itemsize
                        + out_bytes),
    )

    return pl.pallas_call(
        kernel,
        out_shape=jax.ShapeDtypeStruct((B, Hp, Wp, E_pad), x.dtype),
        grid_spec=pltpu.PrefetchScalarGridSpec(
            num_scalar_prefetch=0,
            grid=grid,
            in_specs=[
                # One tile of RH patch rows, DMA'd directly from HBM.
                pl.BlockSpec((1, C, rh * pH, Wp, pW),
                             lambda b, t: (b, 0, t, 0, 0)),
                # Constant-index blocks (fetched once, kept resident).  If VMEM
                # headroom is needed (v7x), single-buffer them via
                # pipeline_mode=pl.Buffered(1).
                pl.BlockSpec((K, E_pad), lambda b, t: (0, 0)),
                pl.BlockSpec((1, E_pad), lambda b, t: (0, 0)),
            ],
            out_specs=pl.BlockSpec((1, rh, Wp, E_pad), lambda b, t: (b, t, 0, 0)),
        ),
        compiler_params=pltpu.CompilerParams(
            dimension_semantics=("parallel", "parallel"),
            vmem_limit_bytes=32 * 1024 * 1024,
        ),
        cost_estimate=cost,
    )(x5, w_kE, bias_row)


# ----------------------------- module wrapper ---------------------------------
class PatchEmbed2Pallas:
    """Image to patch embedding: Conv2d(in_chans, embed_dim, k=patch, stride=patch)."""

    def __init__(self, img_size=224, patch_size=16, in_chans=3, embed_dim=768,
                 compute_dtype=jnp.bfloat16, key=jax.random.PRNGKey(0)):
        def to_2tuple(v):
            return tuple(v) if isinstance(v, (tuple, list)) else (v, v)

        self.img_size = to_2tuple(img_size)
        self.patch_size = to_2tuple(patch_size)
        self.num_patches = (self.img_size[1] // self.patch_size[1]) * (
            self.img_size[0] // self.patch_size[0])
        self.in_chans = in_chans
        self.embed_dim = embed_dim
        self.compute_dtype = compute_dtype

        kH, kW = self.patch_size
        fan_in = in_chans * kH * kW
        bound = 1.0 / math.sqrt(fan_in)
        kw_key, kb_key = jax.random.split(key)
        # Same parameterisation as nn.Conv2d: weight (E, C, kH, kW), bias (E,).
        self.weight = jax.random.uniform(
            kw_key, (embed_dim, in_chans, kH, kW), jnp.float32, -bound, bound)
        self.bias = jax.random.uniform(kb_key, (embed_dim,), jnp.float32, -bound, bound)

        # Kernel-side parameters, prepared once at init (no per-call transpose):
        # weight flattened to (K, E) in (c, ph, pw) order, E zero-padded to a
        # lane-dense multiple of 128, stored in the MXU compute dtype.
        K = in_chans * kH * kW
        E_pad = _round_up(embed_dim, 128)
        w_kE = self.weight.reshape(embed_dim, K).T                       # (K, E)
        w_kE = jnp.pad(w_kE, ((0, 0), (0, E_pad - embed_dim)))
        self._w_kernel = w_kE.astype(compute_dtype)                      # (K, E_pad)
        self._b_kernel = jnp.pad(self.bias, (0, E_pad - embed_dim)).reshape(1, E_pad)
        self._e_pad = E_pad

    def __call__(self, x, channels_last=False):
        B, C, H, W = x.shape
        assert H == self.img_size[0] and W == self.img_size[1], (
            f"Input image size ({H}*{W}) doesn't match model "
            f"({self.img_size[0]}*{self.img_size[1]}).")
        assert C == self.in_chans

        out = patch_proj_pallas(x, self._w_kernel, self._b_kernel, self.patch_size,
                                compute_dtype=self.compute_dtype)   # (B, Hp, Wp, E_pad)
        out = out[..., :self.embed_dim]                              # (B, Hp, Wp, E)
        if channels_last:
            return out   # lane-dense layout preferred by downstream ViT blocks
        # PyTorch-compatible NCHW' output, done once at the module boundary.
        return out.transpose(0, 3, 1, 2)                             # (B, E, Hp, Wp)


# ----------------------------------- main -------------------------------------
if __name__ == "__main__":
    key = jax.random.PRNGKey(0)
    k_x, k_params = jax.random.split(key)

    # Small shapes consistent with the module: B=2, C=4, H=W=16, patch=8, embed=32.
    B, C, H, W = 2, 4, 16, 16
    patch = 8
    embed_dim = 32

    x = jax.random.normal(k_x, (B, C, H, W), jnp.float32)
    model = PatchEmbed2Pallas(img_size=H, patch_size=patch, in_chans=C,
                              embed_dim=embed_dim, key=k_params)

    out = jax.block_until_ready(model(x))
    assert out.shape == (B, embed_dim, H // patch, W // patch), out.shape

    # Exact reference for the kernel's math: identical bf16-rounded operands,
    # fp32 accumulation (same products, only summation order may differ).
    xq = x.astype(jnp.bfloat16).astype(jnp.float32)
    wq = model.weight.astype(jnp.bfloat16).astype(jnp.float32)
    ref = jax.lax.conv_general_dilated(
        xq, wq, window_strides=(patch, patch), padding="VALID",
        dimension_numbers=("NCHW", "OIHW", "NCHW"),
    ) + model.bias.reshape(1, embed_dim, 1, 1)
    np.testing.assert_allclose(np.asarray(out), np.asarray(ref), rtol=1e-4, atol=1e-4)

    # Loose check against the full-fp32 Conv2d semantics of the PyTorch module.
    ref_f32 = jax.lax.conv_general_dilated(
        x, model.weight, window_strides=(patch, patch), padding="VALID",
        dimension_numbers=("NCHW", "OIHW", "NCHW"),
    ) + model.bias.reshape(1, embed_dim, 1, 1)
    np.testing.assert_allclose(np.asarray(out), np.asarray(ref_f32), rtol=5e-2, atol=5e-2)

    print("KERNEL_OK")
</pallas_src>

<mosaic_0001>
module attributes {stable_mosaic.version = 11 : i64} {
  func.func @_patch_embed_kernel(%arg0: i32, %arg1: i32, %arg2: memref<1x4x16x2x8xf32, #tpu.memory_space<vmem>>, %arg3: memref<256x128xbf16, #tpu.memory_space<vmem>>, %arg4: memref<1x128xf32, #tpu.memory_space<vmem>>, %arg5: memref<1x2x2x128xf32, #tpu.memory_space<vmem>>) attributes {dimension_semantics = [#tpu.dimension_semantics<parallel>, #tpu.dimension_semantics<parallel>], iteration_bounds = array<i64: 2, 1>, scalar_prefetch = 0 : i64, scratch_operands = 0 : i64, tpu.core_type = #tpu.core_type<tc>, window_params = [{transform_indices = @transform_0, window_bounds = array<i64: 1, 4, 16, 2, 8>}, {pipeline_mode = #tpu.pipeline_mode<synchronous>, transform_indices = @transform_1, window_bounds = array<i64: 256, 128>}, {pipeline_mode = #tpu.pipeline_mode<synchronous>, transform_indices = @transform_2, window_bounds = array<i64: 1, 128>}, {transform_indices = @transform_3, window_bounds = array<i64: 1, 2, 2, 128>}]} {
    %c0 = arith.constant 0 : index
    %c0_0 = arith.constant 0 : index
    %0 = vector.load %arg3[%c0, %c0_0] : memref<256x128xbf16, #tpu.memory_space<vmem>>, vector<256x128xbf16>
    %c0_1 = arith.constant 0 : index
    %c0_2 = arith.constant 0 : index
    %1 = vector.load %arg4[%c0_1, %c0_2] : memref<1x128xf32, #tpu.memory_space<vmem>>, vector<1x128xf32>
    %2 = vector.shape_cast %1 : vector<1x128xf32> to vector<1x128xf32>
    %3 = vector.broadcast %2 : vector<1x128xf32> to vector<2x128xf32>
    %c0_3 = arith.constant 0 : index
    %c0_4 = arith.constant 0 : index
    %c0_5 = arith.constant 0 : index
    %c0_6 = arith.constant 0 : index
    %c0_7 = arith.constant 0 : index
    %4 = vector.load %arg2[%c0_3, %c0_4, %c0_5, %c0_6, %c0_7] : memref<1x4x16x2x8xf32, #tpu.memory_space<vmem>>, vector<1x4x8x2x8xf32>
    %5 = vector.shape_cast %4 : vector<1x4x8x2x8xf32> to vector<4x8x2x8xf32>
    %6 = tpu.transpose %5, [0, 1, 3, 2] : vector<4x8x2x8xf32> -> vector<4x8x8x2xf32>
    %7 = vector.shape_cast %6 : vector<4x8x8x2xf32> to vector<256x2xf32>
    %8 = tpu.transpose %7, [1, 0] : vector<256x2xf32> -> vector<2x256xf32>
    %9 = arith.truncf %8 : vector<2x256xf32> to vector<2x256xbf16>
    %cst = arith.constant dense<0.000000e+00> : vector<2x128xf32>
    %10 = tpu.matmul %9, %0, %cst {dimension_numbers = #tpu.dot_dimension_numbers<[1], [0], [0], [1], [0, 0, 1, 1], [], []>} : vector<2x256xbf16>, vector<256x128xbf16>, vector<2x128xf32> -> vector<2x128xf32>
    %11 = arith.addf %10, %3 : vector<2x128xf32>
    %c0_8 = arith.constant 0 : index
    %c0_9 = arith.constant 0 : index
    %c0_10 = arith.constant 0 : index
    %c0_11 = arith.constant 0 : index
    %12 = vector.load %arg5[%c0_8, %c0_9, %c0_10, %c0_11] : memref<1x2x2x128xf32, #tpu.memory_space<vmem>>, vector<1x1x2x128xf32>
    %13 = vector.shape_cast %12 : vector<1x1x2x128xf32> to vector<2x128xf32>
    %14 = vector.shape_cast %11 : vector<2x128xf32> to vector<1x1x2x128xf32>
    tpu.vector_store %arg5[%c0_8, %c0_9, %c0_10, %c0_11], %14 {strides = array<i32>} : memref<1x2x2x128xf32, #tpu.memory_space<vmem>>, vector<1x1x2x128xf32>,
    %c0_12 = arith.constant 0 : index
    %c0_13 = arith.constant 0 : index
    %c8 = arith.constant 8 : index
    %c0_14 = arith.constant 0 : index
    %c0_15 = arith.constant 0 : index
    %15 = vector.load %arg2[%c0_12, %c0_13, %c8, %c0_14, %c0_15] : memref<1x4x16x2x8xf32, #tpu.memory_space<vmem>>, vector<1x4x8x2x8xf32>
    %16 = vector.shape_cast %15 : vector<1x4x8x2x8xf32> to vector<4x8x2x8xf32>
    %17 = tpu.transpose %16, [0, 1, 3, 2] : vector<4x8x2x8xf32> -> vector<4x8x8x2xf32>
    %18 = vector.shape_cast %17 : vector<4x8x8x2xf32> to vector<256x2xf32>
    %19 = tpu.transpose %18, [1, 0] : vector<256x2xf32> -> vector<2x256xf32>
    %20 = arith.truncf %19 : vector<2x256xf32> to vector<2x256xbf16>
    %cst_16 = arith.constant dense<0.000000e+00> : vector<2x128xf32>
    %21 = tpu.matmul %20, %0, %cst_16 {dimension_numbers = #tpu.dot_dimension_numbers<[1], [0], [0], [1], [0, 0, 1, 1], [], []>} : vector<2x256xbf16>, vector<256x128xbf16>, vector<2x128xf32> -> vector<2x128xf32>
    %22 = arith.addf %21, %3 : vector<2x128xf32>
    %c0_17 = arith.constant 0 : index
    %c1 = arith.constant 1 : index
    %c0_18 = arith.constant 0 : index
    %c0_19 = arith.constant 0 : index
    %23 = vector.load %arg5[%c0_17, %c1, %c0_18, %c0_19] : memref<1x2x2x128xf32, #tpu.memory_space<vmem>>, vector<1x1x2x128xf32>
    %24 = vector.shape_cast %23 : vector<1x1x2x128xf32> to vector<2x128xf32>
    %25 = vector.shape_cast %22 : vector<2x128xf32> to vector<1x1x2x128xf32>
    tpu.vector_store %arg5[%c0_17, %c1, %c0_18, %c0_19], %25 {strides = array<i32>} : memref<1x2x2x128xf32, #tpu.memory_space<vmem>>, vector<1x1x2x128xf32>,
    return
  }
  func.func @transform_0(%arg0: i32, %arg1: i32) -> (i32, i32, i32, i32, i32) {
    %c0_i32 = arith.constant 0 : i32
    %c0_i32_0 = arith.constant 0 : i32
    %c0_i32_1 = arith.constant 0 : i32
    %c0_i32_2 = arith.constant 0 : i32
    return %arg0, %c0_i32, %arg1, %c0_i32_0, %c0_i32_1 : i32, i32, i32, i32, i32
  }
  func.func @transform_1(%arg0: i32, %arg1: i32) -> (i32, i32) {
    %c0_i32 = arith.constant 0 : i32
    %c0_i32_0 = arith.constant 0 : i32
    %c0_i32_1 = arith.constant 0 : i32
    return %c0_i32, %c0_i32_0 : i32, i32
  }
  func.func @transform_2(%arg0: i32, %arg1: i32) -> (i32, i32) {
    %c0_i32 = arith.constant 0 : i32
    %c0_i32_0 = arith.constant 0 : i32
    %c0_i32_1 = arith.constant 0 : i32
    return %c0_i32, %c0_i32_0 : i32, i32
  }
  func.func @transform_3(%arg0: i32, %arg1: i32) -> (i32, i32, i32, i32) {
    %c0_i32 = arith.constant 0 : i32
    %c0_i32_0 = arith.constant 0 : i32
    %c0_i32_1 = arith.constant 0 : i32
    return %arg0, %arg1, %c0_i32, %c0_i32_0 : i32, i32, i32, i32
  }
}

</mosaic_0001>

<bundles_post_ra>
// kernel: tpu_custom_call.1
= control target key start
LH: loop header
LB: loop body
LE: loop exit
PB: predicated region body
PF: predicated region fallthrough
CT: control target
= control target key end

     0   :  { %8 = vsyncpa [#allocation3], 0  ;;  %s3575_s0 = inlined_call_operand.vmem [shape: f32[2,4,16,2,8], index: 0, kind: input, shape index: {}]   ;;  %s3576_s1 = inlined_call_operand.vmem [shape: bf16[256,128], index: 1, kind: input, shape index: {}]   ;;  %s3577_s2 = inlined_call_operand.vmem [shape: f32[1,128], index: 2, kind: input, shape index: {}]   ;;  %s3578_s3 = inlined_call_operand.hbm [shape: f32[2,2,2,128], index: 3, kind: output, shape index: {}]  }
   0x1   :  { %10 = vsyncpa [#allocation3 + $0x1], 0  ;;  %s3343_s12 = smov 0   ;;  %s3345_s13 = smov 0  }
   0x2   :  { %s3347_s14 = smov 0   ;;  %s3349_s15 = smov 0  }
   0x3   :  { %s3351_s16 = smov 0   ;;  %s3353_s17 = smov 0  }
   0x4 LB: > { %s2759_s18 = sadd.s32 4294967295, %s3318_s17   ;;  %s2760_s19 = sadd.s32 4294967294, %s3318_s17   ;;  %s3318_s17 = sphi %s3353_s17, %s16_s17   ;;  %s3314_s16 = sphi %s3351_s16, %s3585_s16   ;;  %s3310_s15 = sphi %s3349_s15, %s3584_s15   ;;  %s3306_s14 = sphi %s3347_s14, %s3583_s14   ;;  %s3302_s13 = sphi %s3345_s13, %s3582_s13   ;;  %s3298_s12 = sphi %s3343_s12, %s3581_s12  }
   0x5   : > { %s28_s20 = sadd.s32 1, %s3314_s16  ;;  %s107_s21 = sadd.s32 1, %s3306_s14 }
   0x6   : > { %p30_p0 = scmp.ge.s32.totalorder %s28_s20, 2  ;;  %p117_p1 = scmp.ne.s32.totalorder %s3306_s14, %s3302_s13 }
   0x7   : > { %p118_p2 = scmp.eq.s32.totalorder %s2759_s18, 1  ;;  %p123_p3 = scmp.ne.s32.totalorder %s3302_s13, %s3298_s12 }
   0x8   : > { %s3587_s20 = smov (%p30_p0, %s28_s20), 0  ;;  %p124_p5 = scmp.eq.s32.totalorder %s2760_s19, 1 }
   0x9   : > { %p3383_p4 = por %p118_p2, %p117_p1  ;;  %s102_s23 = ssub.s32 %s3314_s16, %s3587_s20 }
   0xa   : > { %p2763_p6 = scmp.ge.s32.totalorder %s3318_s17, 1  ;;  %p105_p7 = scmp.eq.s32.totalorder %s102_s23, 0 }
   0xb   : > { %p3390_p8 = por %p124_p5, %p123_p3  ;;  %p161_p9 = scmp.lt.s32.totalorder %s3318_s17, 3 }
   0xc   : > { %s3396_s25 = scalar_select %p105_p7, %s3306_s14, %s107_s21  }
   0xd   : > { %p162_p10 = pnand %p2763_p6, %p161_p9 }
   0xe   : > { %p190_p11 = scmp.lt.s32.totalorder (!%p162_p10), %s3310_s15, 1  ;;  %s186_s29 = sand.u32 (!%p162_p10), 1, %s3302_s13  }
   0xf   : > { %165 = sbr.rel (%p162_p10) target bundleno = 527 (0x20f), region = 32  ;;  %s2823_s6 = sshll.u32 (!%p162_p10), %s3310_s15, 6 }
  0x10   : > { %s3527_s10 = scalar_lea.hbm (!%p162_p10), %s3578_s3, %s2823_s6  ;;  %s3529_s11 = scalar_lea.sflag (!%p162_p10), [#allocation3], %s186_s29 }
  0x11   : > { %s3320_s19 = smov (!%p162_p10), [#allocation2]  }
  0x12   : > { %s3244_s21 = sshll.u32 (!%p162_p10), %s3320_s19, 4  ;;  %s3245_s21 = int_to_ptr.vmem [resolvable:$false] %s3244_s21 }
  0x13   : > { %s3246_s23 = scalar_lea.vmem (!%p162_p10), %s3245_s21, 128 }
  0x16   : > { %s191_s26 = scalar_select %p190_p11, %s3310_s15, 1 }
  0x18   : > { %s2822_s27 = sshll.u32 %s191_s26, 7 }
  0x19   : > { %s3403_s30 = scalar_lea.vmem %s3575_s0, %s2822_s27 }
  0x1a   : > { %v256_v0 = vld [vmem:[%s3403_s30 + $0x40] sm:$0x3]  ;;  %v2800_v1 = vld [vmem:[%s3403_s30 + $0x50] sm:$0x3]  ;;  %v257_v2 = vld [vmem:[%s3403_s30 + $0x42] sm:$0x3] }
  0x1b   : > { %v2926_v3 = vpack.i.bf16 %v2800_v1, %v256_v0  ;;  %v2801_v4 = vld [vmem:[%s3403_s30 + $0x52] sm:$0x3]  ;;  %v240_v5 = vld [vmem:[%s3403_s30] sm:$0x3]  ;;  %v2784_v6 = vld [vmem:[%s3403_s30 + $0x10] sm:$0x3] }
  0x1c   : > { %v2940_v7 = vpack.i.bf16 %v2801_v4, %v257_v2  ;;  %v241_v8 = vld [vmem:[%s3403_s30 + $0x2] sm:$0x3]  ;;  %v2785_v9 = vld [vmem:[%s3403_s30 + $0x12] sm:$0x3]  ;;  %v2933_v10 = vpack.i.bf16 %v2784_v6, %v240_v5  ;;  %v258_v12 = vld [vmem:[%s3403_s30 + $0x44] sm:$0x3] }
  0x1d   : > { %2927 = vxpose.xlu0.b32.start.end [1/1] (short) (narrow) %v2926_v3, 8  ;;  %v2947_v11 = vpack.i.bf16 %v2785_v9, %v241_v8  ;;  %v2802_v13 = vld [vmem:[%s3403_s30 + $0x54] sm:$0x3]  ;;  %v242_v14 = vld [vmem:[%s3403_s30 + $0x4] sm:$0x3] }
  0x1e   : > { %2941 = vxpose.xlu1.b32.start.end [1/1] (short) (narrow) %v2940_v7, 8  ;;  %v2786_v15 = vld [vmem:[%s3403_s30 + $0x14] sm:$0x3]  ;;  %v2954_v16 = vpack.i.bf16 %v2802_v13, %v258_v12  ;;  %v259_v18 = vld [vmem:[%s3403_s30 + $0x46] sm:$0x3] }
  0x1f   : > { %v2961_v17 = vpack.i.bf16 %v2786_v15, %v242_v14  ;;  %v2803_v19 = vld [vmem:[%s3403_s30 + $0x56] sm:$0x3]  ;;  %v243_v20 = vld [vmem:[%s3403_s30 + $0x6] sm:$0x3]  ;;  %v260_v24 = vld [vmem:[%s3403_s30 + $0x48] sm:$0x3] }
  0x20   : > { %v2787_v21 = vld [vmem:[%s3403_s30 + $0x16] sm:$0x3]  ;;  %v2968_v22 = vpack.i.bf16 %v2803_v19, %v259_v18  ;;  %v2804_v25 = vld [vmem:[%s3403_s30 + $0x58] sm:$0x3]  ;;  %v244_v26 = vld [vmem:[%s3403_s30 + $0x8] sm:$0x3] }
  0x21   : > { %2934 = vxpose.xlu0.b32.start.end [1/1] (short) (narrow) %v2933_v10, 8  ;;  %v2975_v23 = vpack.i.bf16 %v2787_v21, %v243_v20  ;;  %v2788_v27 = vld [vmem:[%s3403_s30 + $0x18] sm:$0x3]  ;;  %v2982_v28 = vpack.i.bf16 %v2804_v25, %v260_v24  ;;  %v261_v30 = vld [vmem:[%s3403_s30 + $0x4a] sm:$0x3] }
  0x22   : > { %2948 = vxpose.xlu1.b32.start.end [1/1] (short) (narrow) %v2947_v11, 8  ;;  %v2989_v29 = vpack.i.bf16 %v2788_v27, %v244_v26  ;;  %v2805_v31 = vld [vmem:[%s3403_s30 + $0x5a] sm:$0x3]  ;;  %v245_v32 = vld [vmem:[%s3403_s30 + $0xa] sm:$0x3] }
  0x23   : > { %v2789_v33 = vld [vmem:[%s3403_s30 + $0x1a] sm:$0x3]  ;;  %v2996_v34 = vpack.i.bf16 %v2805_v31, %v261_v30  ;;  %v262_v36 = vld [vmem:[%s3403_s30 + $0x4c] sm:$0x3]  ;;  %v2806_v37 = vld [vmem:[%s3403_s30 + $0x5c] sm:$0x3] }
  0x24   : > { %v3003_v35 = vpack.i.bf16 %v2789_v33, %v245_v32  ;;  %v246_v38 = vld [vmem:[%s3403_s30 + $0xc] sm:$0x3]  ;;  %v2790_v39 = vld [vmem:[%s3403_s30 + $0x1c] sm:$0x3]  ;;  %v3010_v40 = vpack.i.bf16 %v2806_v37, %v262_v36  ;;  %v263_v41 = vld [vmem:[%s3403_s30 + $0x4e] sm:$0x3] }
  0x25   : > { %2955 = vxpose.xlu0.b32.start.end [1/1] (short) (narrow) %v2954_v16, 8  ;;  %v3017_v42 = vpack.i.bf16 %v2790_v39, %v246_v38  ;;  %v2807_v43 = vld [vmem:[%s3403_s30 + $0x5e] sm:$0x3]  ;;  %v247_v44 = vld [vmem:[%s3403_s30 + $0xe] sm:$0x3]  ;;  %v3224_v32 = vld [vmem:[%s3576_s1 + $0x40] sm:$0xff]  }
  0x26   : > { %2962 = vxpose.xlu1.b32.start.end [1/1] (short) (narrow) %v2961_v17, 8  ;;  %v2791_v45 = vld [vmem:[%s3403_s30 + $0x1e] sm:$0x3]  ;;  %v264_v46 = vld [vmem:[%s3403_s30 + $0x60] sm:$0x3]  ;;  %v3024_v48 = vpack.i.bf16 %v2807_v43, %v263_v41  ;;  %2824 = vmatprep.subr.bf16.mxu0 %v3224_v32  ;;  %v3228_v36 = vld [vmem:[%s3576_s1 + $0x50] sm:$0xff]  }
  0x27   : > { %v2808_v47 = vld [vmem:[%s3403_s30 + $0x70] sm:$0x3]  ;;  %v248_v49 = vld [vmem:[%s3403_s30 + $0x20] sm:$0x3]  ;;  %v3031_v51 = vpack.i.bf16 %v2791_v45, %v247_v44  ;;  %v265_v54 = vld [vmem:[%s3403_s30 + $0x62] sm:$0x3]  ;;  %2846 = vmatprep.subr.bf16.mxu1 %v3224_v32 }
  0x28   : > { %v2792_v50 = vld [vmem:[%s3403_s30 + $0x30] sm:$0x3]  ;;  %v3038_v52 = vpack.i.bf16 %v2808_v47, %v264_v46  ;;  %v2809_v55 = vld [vmem:[%s3403_s30 + $0x72] sm:$0x3]  ;;  %v249_v56 = vld [vmem:[%s3403_s30 + $0x22] sm:$0x3] }
  0x29   : > { %2969 = vxpose.xlu0.b32.start.end [1/1] (short) (narrow) %v2968_v22, 8  ;;  %v3045_v53 = vpack.i.bf16 %v2792_v50, %v248_v49  ;;  %v2793_v57 = vld [vmem:[%s3403_s30 + $0x32] sm:$0x3]  ;;  %v3052_v58 = vpack.i.bf16 %v2809_v55, %v265_v54  ;;  %v266_v60 = vld [vmem:[%s3403_s30 + $0x64] sm:$0x3]  ;;  %v3230_v38 = vld [vmem:[%s3576_s1 + $0x58] sm:$0xff]  }
  0x2a   : > { %2976 = vxpose.xlu1.b32.start.end [1/1] (short) (narrow) %v2975_v23, 8  ;;  %v3059_v59 = vpack.i.bf16 %v2793_v57, %v249_v56  ;;  %v2810_v61 = vld [vmem:[%s3403_s30 + $0x74] sm:$0x3]  ;;  %v250_v62 = vld [vmem:[%s3403_s30 + $0x24] sm:$0x3]  ;;  %v3231_v39 = vld [vmem:[%s3576_s1 + $0x18] sm:$0xff]  }
  0x2b   : > { %v2794_v63 = vld [vmem:[%s3403_s30 + $0x34] sm:$0x3]  ;;  %v3066_v0 = vpack.i.bf16 %v2810_v61, %v266_v60  ;;  %v267_v2 = vld [vmem:[%s3403_s30 + $0x66] sm:$0x3]  ;;  %v2811_v3 = vld [vmem:[%s3403_s30 + $0x76] sm:$0x3] }
  0x2c   : > { %v3073_v1 = vpack.i.bf16 %v2794_v63, %v250_v62  ;;  %v251_v4 = vld [vmem:[%s3403_s30 + $0x26] sm:$0x3]  ;;  %v2795_v5 = vld [vmem:[%s3403_s30 + $0x36] sm:$0x3]  ;;  %v3080_v6 = vpack.i.bf16 %v2811_v3, %v267_v2  ;;  %v268_v8 = vld [vmem:[%s3403_s30 + $0x68] sm:$0x3] }
  0x2d   : > { %2983 = vxpose.xlu0.b32.start.end [1/1] (short) (narrow) %v2982_v28, 8  ;;  %v3087_v7 = vpack.i.bf16 %v2795_v5, %v251_v4  ;;  %v2812_v9 = vld [vmem:[%s3403_s30 + $0x78] sm:$0x3]  ;;  %v252_v10 = vld [vmem:[%s3403_s30 + $0x28] sm:$0x3]  ;;  %v3225_v33 = vld [vmem:[%s3576_s1] sm:$0xff]  }
  0x2e   : > { %2990 = vxpose.xlu1.b32.start.end [1/1] (short) (narrow) %v2989_v29, 8  ;;  %v2796_v11 = vld [vmem:[%s3403_s30 + $0x38] sm:$0x3]  ;;  %v3094_v12 = vpack.i.bf16 %v2812_v9, %v268_v8  ;;  %v269_v14 = vld [vmem:[%s3403_s30 + $0x6a] sm:$0x3]  ;;  %2825 = vmatpush3.bf16.msra.mxu0 %v3225_v33  ;;  %v3229_v37 = vld [vmem:[%s3576_s1 + $0x10] sm:$0xff]  }
  0x2f   : > { %v3101_v13 = vpack.i.bf16 %v2796_v11, %v252_v10  ;;  %v2813_v15 = vld [vmem:[%s3403_s30 + $0x7a] sm:$0x3]  ;;  %v253_v16 = vld [vmem:[%s3403_s30 + $0x2a] sm:$0x3]  ;;  %v270_v20 = vld [vmem:[%s3403_s30 + $0x6c] sm:$0x3]  ;;  %2847 = vmatpush3.bf16.msra.mxu1 %v3225_v33 }
  0x30   : > { %v2797_v17 = vld [vmem:[%s3403_s30 + $0x3a] sm:$0x3]  ;;  %v3108_v18 = vpack.i.bf16 %v2813_v15, %v269_v14  ;;  %v2814_v21 = vld [vmem:[%s3403_s30 + $0x7c] sm:$0x3]  ;;  %v254_v22 = vld [vmem:[%s3403_s30 + $0x2c] sm:$0x3] }
  0x31   : > { %2997 = vxpose.xlu0.b32.start.end [1/1] (short) (narrow) %v2996_v34, 8  ;;  %v3115_v19 = vpack.i.bf16 %v2797_v17, %v253_v16  ;;  %v2798_v23 = vld [vmem:[%s3403_s30 + $0x3c] sm:$0x3]  ;;  %v3122_v24 = vpack.i.bf16 %v2814_v21, %v270_v20  ;;  %v271_v26 = vld [vmem:[%s3403_s30 + $0x6e] sm:$0x3]  ;;  %v3233_v41 = vld [vmem:[%s3576_s1 + $0x20] sm:$0xff]  }
  0x32   : > { %3004 = vxpose.xlu1.b32.start.end [1/1] (short) (narrow) %v3003_v35, 8  ;;  %v3129_v25 = vpack.i.bf16 %v2798_v23, %v254_v22  ;;  %v2815_v27 = vld [vmem:[%s3403_s30 + $0x7e] sm:$0x3]  ;;  %v255_v28 = vld [vmem:[%s3403_s30 + $0x2e] sm:$0x3]  ;;  %v3236_v44 = vld [vmem:[%s3576_s1 + $0x70] sm:$0xff]  }
  0x33   : > { %v2799_v29 = vld [vmem:[%s3403_s30 + $0x3e] sm:$0x3]  ;;  %v3136_v30 = vpack.i.bf16 %v2815_v27, %v271_v26  ;;  %v3226_v34 = vld [vmem:[%s3576_s1 + $0x48] sm:$0xff]   ;;  %v3237_v45 = vld [vmem:[%s3576_s1 + $0x30] sm:$0xff]   ;;  %s2764_s30 = sshll.u32 %s186_s29, 2 }
  0x34   : > { %v3143_v31 = vpack.i.bf16 %v2799_v29, %v255_v28  ;;  %v3227_v35 = vld [vmem:[%s3576_s1 + $0x8] sm:$0xff]   ;;  %2826 = vmatprep.subr.bf16.mxu0 %v3226_v34  ;;  %2848 = vmatprep.subr.bf16.mxu1 %v3226_v34  ;;  %s188_s4 = scalar_lea.vmem [#allocation2], %s2764_s30  ;;  %v2767_v28 = vld [vmem:[%s3577_s2] ss:$0 sm:$0xff] }
  0x35   : > { %3011 = vxpose.xlu0.b32.start.end [1/1] (short) (narrow) %v3010_v40, 8  ;;  %2827 = vmatpush3.bf16.msra.mxu0 %v3227_v35  ;;  %v3232_v40 = vld [vmem:[%s3576_s1 + $0x60] sm:$0xff]   ;;  %v3235_v43 = vld [vmem:[%s3576_s1 + $0x28] sm:$0xff]   ;;  %s2680_s5 = sshll.u32 %s188_s4, 4  ;;  %s3522_s5 = int_to_ptr.vmem [resolvable:$true] %s2680_s5 }
  0x36   : > { %3018 = vxpose.xlu1.b32.start.end [1/1] (short) (narrow) %v3017_v42, 8  ;;  %2849 = vmatpush3.bf16.msra.mxu1 %v3227_v35  ;;  %v3234_v42 = vld [vmem:[%s3576_s1 + $0x68] sm:$0xff]   ;;  %s3240_s18 = scalar_lea.vmem %s3522_s5, 64  ;;  %p3247_p1 = scmp.lt.s32.totalorder %s3522_s5, %s3245_s21 }
  0x37   : > { %2828 = vmatprep.subr.bf16.mxu0 %v3228_v36  ;;  %2850 = vmatprep.subr.bf16.mxu1 %v3228_v36  ;;  %p3241_p12 = scmp.ne.s32.totalorder %s3522_s5, %s3240_s18  ;;  %p3248_p2 = scmp.lt.s32.totalorder %s3246_s23, %s3240_s18 }
  0x39   : > { %3025 = vxpose.xlu0.b32.start.end [1/1] (short) (narrow) %v3024_v48, 8  ;;  %2829 = vmatpush3.bf16.msra.mxu0 %v3229_v37  ;;  %p3242_p13 = pnand %p3241_p12, %p3383_p4  ;;  %p3249_p3 = por %p3248_p2, %p3247_p1 }
  0x3a   : > { %3032 = vxpose.xlu1.b32.start.end [1/1] (short) (narrow) %v3031_v51, 8  ;;  %2851 = vmatpush3.bf16.msra.mxu1 %v3229_v37  ;;  %v3238_v51 = vld [vmem:[%s3576_s1 + $0x78] sm:$0xff]  }
  0x3b   : > { %2830 = vmatprep.subr.bf16.mxu0 %v3230_v38  ;;  %2852 = vmatprep.subr.bf16.mxu1 %v3230_v38  ;;  %p3243_p0 = pneg %p3242_p13 }
  0x3d   : > { %3039 = vxpose.xlu0.b32.start.end [1/1] (short) (narrow) %v3038_v52, 8  ;;  %2831 = vmatpush3.bf16.msra.mxu0 %v3231_v39  ;;  %p3250_p5 = pnand %p3249_p3, %p3243_p0 }
  0x3e   : > { %3046 = vxpose.xlu1.b32.start.end [1/1] (short) (narrow) %v3045_v53, 8  ;;  %2853 = vmatpush3.bf16.msra.mxu1 %v3231_v39  ;;  %v3239_v53 = vld [vmem:[%s3576_s1 + $0x38] sm:$0xff]  }
  0x3f   : > { %2832 = vmatprep.subr.bf16.mxu0 %v3232_v40  ;;  %2854 = vmatprep.subr.bf16.mxu1 %v3232_v40 }
  0x41   : > { %3053 = vxpose.xlu0.b32.start.end [1/1] (short) (narrow) %v3052_v58, 8  ;;  %2833 = vmatpush3.bf16.msra.mxu0 %v3233_v41 }
  0x42   : > { %3060 = vxpose.xlu1.b32.start.end [1/1] (short) (narrow) %v3059_v59, 8  ;;  %2855 = vmatpush3.bf16.msra.mxu1 %v3233_v41 }
  0x43   : > { %2834 = vmatprep.subr.bf16.mxu0 %v3234_v42  ;;  %2856 = vmatprep.subr.bf16.mxu1 %v3234_v42 }
  0x45   : > { %3067 = vxpose.xlu0.b32.start.end [1/1] (short) (narrow) %v3066_v0, 8  ;;  %2835 = vmatpush3.bf16.msra.mxu0 %v3235_v43 }
  0x46   : > { %3074 = vxpose.xlu1.b32.start.end [1/1] (short) (narrow) %v3073_v1, 8  ;;  %2857 = vmatpush3.bf16.msra.mxu1 %v3235_v43 }
  0x47   : > { %2836 = vmatprep.subr.bf16.mxu0 %v3236_v44  ;;  %2858 = vmatprep.subr.bf16.mxu1 %v3236_v44 }
  0x49   : > { %3081 = vxpose.xlu0.b32.start.end [1/1] (short) (narrow) %v3080_v6, 8  ;;  %2837 = vmatpush3.bf16.msra.mxu0 %v3237_v45 }
  0x4a   : > { %3088 = vxpose.xlu1.b32.start.end [1/1] (short) (narrow) %v3087_v7, 8  ;;  %2859 = vmatpush3.bf16.msra.mxu1 %v3237_v45 }
  0x4b   : > { %2838 = vmatprep.subr.bf16.mxu0 %v3238_v51  ;;  %2860 = vmatprep.subr.bf16.mxu1 %v3238_v51 }
  0x4d   : > { %3095 = vxpose.xlu0.b32.start.end [1/1] (short) (narrow) %v3094_v12, 8  ;;  %2839 = vmatpush3.bf16.msra.mxu0 %v3239_v53 }
  0x4e   : > { %3102 = vxpose.xlu1.b32.start.end [1/1] (short) (narrow) %v3101_v13, 8  ;;  %2861 = vmatpush3.bf16.msra.mxu1 %v3239_v53 }
  0x51   : > { %3109 = vxpose.xlu0.b32.start.end [1/1] (short) (narrow) %v3108_v18, 8 }
  0x52   : > { %3116 = vxpose.xlu1.b32.start.end [1/1] (short) (narrow) %v3115_v19, 8 }
  0x55   : > { %3123 = vxpose.xlu0.b32.start.end [1/1] (short) (narrow) %v3122_v24, 8 }
  0x56   : > { %3130 = vxpose.xlu1.b32.start.end [1/1] (short) (narrow) %v3129_v25, 8 }
  0x59   : > { %3137 = vxpose.xlu0.b32.start.end [1/1] (short) (narrow) %v3136_v30, 8 }
  0x5a   : > { %3144 = vxpose.xlu1.b32.start.end [1/1] (short) (narrow) %v3143_v31, 8 }
  0x9d   : > { %v2928_v46 = vpop.trf.xlu0 }
  0x9e   : > { %v2942_v47 = vpop.trf.xlu1  ;;  %3151 = vxpose.xlu0.b32.start [1/16] (narrow) %v2928_v46, 8 }
  0xa1   : > { %v2935_v48 = vpop.trf.xlu0 }
  0xa2   : > { %v2949_v49 = vpop.trf.xlu1  ;;  %3153 = vxpose.xlu0.b32.cont [2/16] (narrow) %v2942_v47, 8  ;;  %3188 = vxpose.xlu1.b32.start [1/16] (narrow) %v2935_v48, 8 }
  0xa5   : > { %v2956_v50 = vpop.trf.xlu0 }
  0xa6   : > { %v2963_v52 = vpop.trf.xlu1  ;;  %3190 = vxpose.xlu1.b32.cont [2/16] (narrow) %v2949_v49, 8  ;;  %3155 = vxpose.xlu0.b32.cont [3/16] (narrow) %v2956_v50, 8 }
  0xa9   : > { %v2970_v54 = vpop.trf.xlu0 }
  0xaa   : > { %v2977_v55 = vpop.trf.xlu1  ;;  %3192 = vxpose.xlu1.b32.cont [3/16] (narrow) %v2963_v52, 8  ;;  %3157 = vxpose.xlu0.b32.cont [4/16] (narrow) %v2970_v54, 8 }
  0xad   : > { %v2984_v56 = vpop.trf.xlu0 }
  0xae   : > { %v2991_v57 = vpop.trf.xlu1  ;;  %3194 = vxpose.xlu1.b32.cont [4/16] (narrow) %v2977_v55, 8  ;;  %3159 = vxpose.xlu0.b32.cont [5/16] (narrow) %v2984_v56, 8 }
  0xb1   : > { %v2998_v58 = vpop.trf.xlu0 }
  0xb2   : > { %v3005_v59 = vpop.trf.xlu1  ;;  %3196 = vxpose.xlu1.b32.cont [5/16] (narrow) %v2991_v57, 8  ;;  %3161 = vxpose.xlu0.b32.cont [6/16] (narrow) %v2998_v58, 8 }
  0xb5   : > { %v3012_v60 = vpop.trf.xlu0 }
  0xb6   : > { %v3019_v61 = vpop.trf.xlu1  ;;  %3198 = vxpose.xlu1.b32.cont [6/16] (narrow) %v3005_v59, 8  ;;  %3163 = vxpose.xlu0.b32.cont [7/16] (narrow) %v3012_v60, 8 }
  0xb9   : > { %v3026_v62 = vpop.trf.xlu0 }
  0xba   : > { %v3033_v63 = vpop.trf.xlu1  ;;  %3200 = vxpose.xlu1.b32.cont [7/16] (narrow) %v3019_v61, 8  ;;  %3165 = vxpose.xlu0.b32.cont [8/16] (narrow) %v3026_v62, 8 }
  0xbd   : > { %v3040_v0 = vpop.trf.xlu0 }
  0xbe   : > { %v3047_v1 = vpop.trf.xlu1  ;;  %3202 = vxpose.xlu1.b32.cont [8/16] (narrow) %v3033_v63, 8  ;;  %3167 = vxpose.xlu0.b32.cont [9/16] (narrow) %v3040_v0, 8 }
  0xc1   : > { %v3054_v2 = vpop.trf.xlu0 }
  0xc2   : > { %v3061_v3 = vpop.trf.xlu1  ;;  %3204 = vxpose.xlu1.b32.cont [9/16] (narrow) %v3047_v1, 8  ;;  %3169 = vxpose.xlu0.b32.cont [10/16] (narrow) %v3054_v2, 8 }
  0xc5   : > { %v3068_v4 = vpop.trf.xlu0 }
  0xc6   : > { %v3075_v5 = vpop.trf.xlu1  ;;  %3206 = vxpose.xlu1.b32.cont [10/16] (narrow) %v3061_v3, 8  ;;  %3171 = vxpose.xlu0.b32.cont [11/16] (narrow) %v3068_v4, 8 }
  0xc9   : > { %v3082_v6 = vpop.trf.xlu0 }
  0xca   : > { %v3089_v7 = vpop.trf.xlu1  ;;  %3208 = vxpose.xlu1.b32.cont [11/16] (narrow) %v3075_v5, 8  ;;  %3173 = vxpose.xlu0.b32.cont [12/16] (narrow) %v3082_v6, 8 }
  0xcd   : > { %v3096_v8 = vpop.trf.xlu0 }
  0xce   : > { %v3103_v9 = vpop.trf.xlu1  ;;  %3210 = vxpose.xlu1.b32.cont [12/16] (narrow) %v3089_v7, 8  ;;  %3175 = vxpose.xlu0.b32.cont [13/16] (narrow) %v3096_v8, 8 }
  0xd1   : > { %v3110_v10 = vpop.trf.xlu0 }
  0xd2   : > { %v3117_v11 = vpop.trf.xlu1  ;;  %3212 = vxpose.xlu1.b32.cont [13/16] (narrow) %v3103_v9, 8  ;;  %3177 = vxpose.xlu0.b32.cont [14/16] (narrow) %v3110_v10, 8 }
  0xd5   : > { %v3124_v12 = vpop.trf.xlu0 }
  0xd6   : > { %v3131_v13 = vpop.trf.xlu1  ;;  %3214 = vxpose.xlu1.b32.cont [14/16] (narrow) %v3117_v11, 8  ;;  %3179 = vxpose.xlu0.b32.cont [15/16] (narrow) %v3124_v12, 8 }
  0xd9   : > { %v3138_v14 = vpop.trf.xlu0 }
  0xda   : > { %v3145_v15 = vpop.trf.xlu1  ;;  %3216 = vxpose.xlu1.b32.cont [15/16] (narrow) %v3131_v13, 8  ;;  %3181 = vxpose.xlu0.b32.end [16/16] (narrow) %v3138_v14, 8 }
  0xde   : > { %3218 = vxpose.xlu1.b32.end [16/16] (narrow) %v3145_v15, 8 }
 0x11e   : > { %v3182_v16 = vpop.trf.xlu0 }
 0x11f   : > { %v3183_v17 = vunpack.i.l.bf16 %v3182_v16  ;;  %v3186_v18 = vunpack.i.h.bf16 %v3182_v16 }
 0x121   : > { %v1361_v19 = vpack.c.bf16 %v3183_v17, %v3183_v17  ;;  %v2621_v20 = vpack.c.bf16 %v3186_v18, %v3186_v18 }
 0x122   : > { %v3219_v21 = vpop.trf.xlu1 }
 0x123   : > { %v3223_v22 = vunpack.i.h.bf16 %v3219_v21  ;;  %v3220_v23 = vunpack.i.l.bf16 %v3219_v21  ;;  %1490 = vmatprep.mubr.bf16.mxu0 %v1361_v19  ;;  %2654 = vmatprep.mubr.bf16.mxu1 %v2621_v20 }
 0x125   : > { %v1360_v24 = vpack.c.bf16 %v3220_v23, %v3220_v23  ;;  %v2620_v25 = vpack.c.bf16 %v3223_v22, %v3223_v22 }
 0x127   : > { %1491 = vmatmul.mubr.bf16.vlgmr.msra.gmra.mrb[0].mxu0 %v1360_v24  ;;  %2655 = vmatmul.mubr.bf16.vlgmr.msra.gmra.mrb[0].mxu1 %v2620_v25 }
 0x1fa   : > { %v2840_v26 = vpop.f32.mrb[0].mxu0  ;;  %v2862_v27 = vpop.f32.mrb[0].mxu1 }
 0x1fb   : > { %v2841_v29 = vpop.f32.mrb[1].mxu0  ;;  %v2863_v30 = vpop.f32.mrb[1].mxu1 }
 0x1fc   : > { %v2842_v31 = vadd.f32 %v2841_v29, %v2840_v26  ;;  %v2864_v32 = vadd.f32 %v2863_v30, %v2862_v27  ;;  %v2843_v33 = vpop.f32.mrb[2].mxu0  ;;  %v2865_v34 = vpop.f32.mrb[2].mxu1 }
 0x1fd   : > { %v2844_v35 = vpop.f32.mrb[3].mxu0  ;;  %v2866_v36 = vpop.f32.mrb[3].mxu1 }
 0x1fe   : > { %v1493_v37 = vadd.f32 %v2842_v31, %v2767_v28  ;;  %v2657_v38 = vadd.f32 %v2864_v32, %v2767_v28 }
 0x200   : > { %1498 = vst [vmem:[%s188_s4] sm:$0x3] %v1493_v37  ;;  %2816 = vst [vmem:[%s188_s4 + $0x2] sm:$0x3] %v2657_v38 }
 0x201   : > { %3253 = shalt.err (!%p3250_p5)
}
 0x202   : > { %s3254_s26 = scalar_lea.hbm %s3527_s10, 64  ;;  %s3258_s29 = scalar_lea.hbm %s3578_s3, 128 }
 0x203   : > { %p3255_p6 = scmp.ne.s32.totalorder %s3527_s10, %s3254_s26  ;;  %p3259_p10 = scmp.lt.u32.totalorder %s3527_s10, %s3578_s3 }
 0x204   : > { %p3260_p11 = scmp.lt.u32.totalorder %s3258_s29, %s3254_s26  ;;  %p3262_p13 = scmp.lt.u32.totalorder %s3254_s26, %s3527_s10 }
 0x205   : > { %p3256_p7 = pnand %p3255_p6, %p3383_p4 }
 0x206   : > { %p3261_p12 = por %p3260_p11, %p3259_p10 }
 0x207   : > { %p3257_p9 = pneg %p3256_p7 }
 0x208   : > { %p3263_p0 = por %p3262_p13, %p3261_p12 }
 0x20a   : > { %p3264_p1 = pnand %p3263_p0, %p3257_p9 }
 0x20c   : > { %3267 = shalt.err (!%p3264_p1)
}
 0x20d   : > { %s3321_s6 = smov 32   ;;  %s3322_s7 = smov 2  }
 0x20e   : > { %2868 = dma.vmem_to_hbm [thread:$0]  (%p3383_p4), %s3522_s5, 64, %s3527_s10, %s3529_s11, %s3321_s6, %s3321_s6, %s3322_s7  }
 0x20f PF: > { %p2874_p2 = scmp.ge.s32.totalorder %s3318_s17, 2  ;;  %s2695_s8 = sand.u32 1, %s3298_s12  }
 0x210   : > { %s2696_s9 = scalar_lea.sflag [#allocation3], %s2695_s8 }
 0x211   : > { %p2871_p3 = pnand %p2874_p2, %p3390_p8 }
 0x213   : > { %3293 = dma.done.wait (!%p2871_p3), %s2696_s9, 64  }
 0x214   : > { %3295 = vsyncadd (!%p2871_p3), %s2696_s9, 4294967232  ;;  %s16_s17 = sadd.s32 1, %s3318_s17   ;;  %s3581_s12 = smov %s3302_s13 }
 0x215   : > { %p13_p5 = scmp.ge.s32.totalorder %s16_s17, 4   ;;  %s3582_s13 = smov %s3306_s14 }
 0x216   : > { %s3583_s14 = smov %s3396_s25  ;;  %s3584_s15 = smov %s3314_s16 }
 0x217   : > { %s3585_s16 = smov %s3587_s20  ;;  %15 = sbr.rel (!%p13_p5) target bundleno = 4 (0x4), region = 69 }
 0x21e   :  { %2701 = vsyncpa [#allocation3], 1 }
 0x21f   :  { %2703 = vsyncpa [#allocation3 + $0x1], 1 }

</bundles_post_ra>
